<compile_context>
chip_gen: v6e
topology: v6e:2x2x1
jax: 0.10.0
libtpu: 0.0.40
codegen_flags: <defaults>
</compile_context>

<pallas_src>
import math

import jax
import jax.numpy as jnp
import numpy as np
from jax.experimental import pallas as pl
from jax.experimental.pallas import tpu as pltpu


def _cdiv(a, b):
    return -(-a // b)


def _round_up(x, m):
    return ((x + m - 1) // m) * m


def _vmem_capacity_bytes():
    try:
        info = pltpu.get_tpu_info()
        cap = getattr(info, "vmem_capacity_bytes", None)
        if cap:
            return int(cap)
    except Exception:
        pass
    return 64 * 1024 * 1024  # conservative fallback: v7x per-TensorCore VMEM


# ---------------------------------------------------------------------------
# Kernel: one tile of input pixel-rows -> both di output sub-rows of that tile.
# ---------------------------------------------------------------------------
def _fused_deconv_bn_silu_kernel(x_ref, w_ref, b_ref, o_ref):
    # x_ref: (tm, C1)            input pixels (rows*W of them), native dtype (f32/bf16)
    # w_ref: (C1, k*k*C2p)       bf16, BN scale folded in; columns ordered (di, dj, c); resident
    # b_ref: (1, k*k*C2p)        f32 folded BN shift, tiled over (di, dj); resident
    # o_ref: (rows, k, W, k*C2p) output rows (n, 2i+di), columns ordered (j, dj, c)
    rows, kk, w_dim, kh = o_ref.shape
    x = x_ref[...].astype(jnp.bfloat16)                                  # in-kernel cast, no HBM pre-pass
    acc = jnp.dot(x, w_ref[...], preferred_element_type=jnp.float32)    # one MXU matmul, N = k*k*C2p
    y = acc + b_ref[...]                                                 # folded BatchNorm affine
    y = y * pl.reciprocal(1.0 + jnp.exp(-y), approx=True)               # SiLU: exp + rcp both on EUP
    y = y.astype(o_ref.dtype)
    # TODO(synk): when W % 8 != 0 this reshape may force a sublane relayout; pad W upstream if hot.
    for di in range(kk):                                                 # static unroll (k == 2)
        o_ref[:, di, :, :] = y[:, di * kh:(di + 1) * kh].reshape(rows, w_dim, kh)


# ---------------------------------------------------------------------------
# Tiling: image-rows per block + consistent VMEM limit, generation aware.
# ---------------------------------------------------------------------------
def _pick_tiling(NR, W, C1, C2p, x_bytes, out_bytes, k=2):
    cap = _vmem_capacity_bytes()
    g = 16 // math.gcd(16, W)                       # granularity keeping tm = rows*W 16-aligned
    Kh, KK = k * C2p, k * k * C2p
    fixed = 2 * C1 * KK * 2 + 2 * KK * 4            # double-buffered bf16 weights + f32 shift
    per_row = (2 * W * C1 * x_bytes                 # x block (x2 buffers)
               + 2 * k * W * Kh * out_bytes         # out block (x2 buffers)
               + 2 * W * KK * 4)                    # f32 matmul / activation temporaries
    vmem_rows = max(0, int(cap * 0.6) - fixed) // per_row
    pix_cap = 8192 if cap > (80 << 20) else 4096    # bigger M tiles on 128 MiB parts (v5e/v6e)
    max_rows = max(g, min(vmem_rows, max(1, pix_cap // W)) // g * g)

    # Smallest even block count >= 2 whose per-block rows fit; even nb balances v7x's two TCs.
    rows = None
    nb = 2
    nb_limit = 2 * _cdiv(NR, g) + 2
    while nb <= nb_limit:
        cand = max(g, _cdiv(_cdiv(NR, nb), g) * g)
        nb_act = _cdiv(NR, cand)
        if cand <= max_rows and (nb_act <= 1 or nb_act % 2 == 0):
            rows = cand
            break
        nb += 2
    if rows is None:
        rows = max_rows                             # even split not achievable; keep VMEM-safe tile

    # TODO(synk): add a W-tiling fallback when even a single g-row block exceeds the budget
    # (very wide W with large channel counts); today we only raise the VMEM limit to match.
    footprint = fixed + rows * per_row
    vmem_limit = min(int(cap * 0.75), max(32 << 20, footprint + (8 << 20)))
    vmem_limit = max(vmem_limit, footprint + (2 << 20))
    vmem_limit = min(vmem_limit, int(cap * 0.9))
    return rows, vmem_limit


# ---------------------------------------------------------------------------
# Main NHWC entry point (no layout glue; preferred inside an NHWC model).
# ---------------------------------------------------------------------------
def conv_transpose_bn_silu_nhwc(x_nhwc, weight, bn_gamma, bn_beta, bn_mean, bn_var,
                                *, k=2, s=2, eps=1e-5, out_dtype=jnp.bfloat16):
    """x_nhwc: (N, H, W, C1); weight: (C1, C2, k, k) (PyTorch ConvTranspose2d layout)."""
    assert k == 2 and s == 2, "specialised for the module defaults k=2, s=2, p=0"
    N, H, W, C1 = x_nhwc.shape
    C1w, C2, kh_, kw_ = weight.shape
    assert (C1w, kh_, kw_) == (C1, k, k)

    # Pad C2 to a 64-multiple (lane-dense 128-wide stores) only when the write amplification
    # stays small; small C2 stays unpadded (masked stores beat 2-8x extra HBM writes + a slice).
    C2p = _round_up(C2, 64)
    if C2p > max(C2, int(1.25 * C2)):
        C2p = C2
    Kh, KK = k * C2p, k * k * C2p

    # Fold eval-mode BatchNorm into the weights (scale) and a per-column shift.
    scale_c = bn_gamma.astype(jnp.float32) * jax.lax.rsqrt(bn_var.astype(jnp.float32) + eps)
    shift_c = bn_beta.astype(jnp.float32) - bn_mean.astype(jnp.float32) * scale_c
    w_scaled = weight.astype(jnp.float32) * scale_c[None, :, None, None]    # (C1, C2, k, k)
    w_t = jnp.transpose(w_scaled, (0, 2, 3, 1))                             # (C1, di, dj, c)
    if C2p != C2:
        w_t = jnp.pad(w_t, ((0, 0), (0, 0), (0, 0), (0, C2p - C2)))
        shift_c = jnp.pad(shift_c, (0, C2p - C2))
    w2 = w_t.reshape(C1, KK).astype(jnp.bfloat16)                           # columns: (di, dj, c)
    shift = jnp.tile(shift_c, (k * k,)).reshape(1, KK)                      # f32

    NR = N * H
    x_bytes = jnp.dtype(x_nhwc.dtype).itemsize
    out_bytes = jnp.dtype(out_dtype).itemsize
    rows, vmem_limit = _pick_tiling(NR, W, C1, C2p, x_bytes, out_bytes, k=k)
    tm = rows * W
    nb = _cdiv(NR, rows)

    x_flat = x_nhwc.reshape(NR * W, C1)     # free reshape: no pad / cast HBM pass over x

    cost = pl.CostEstimate(
        flops=2 * NR * W * C1 * KK,
        transcendentals=NR * W * KK,
        bytes_accessed=NR * W * C1 * x_bytes + C1 * KK * 2 + KK * 4
                       + NR * k * W * Kh * out_bytes,
    )

    out = pl.pallas_call(
        _fused_deconv_bn_silu_kernel,
        out_shape=jax.ShapeDtypeStruct((NR, k, W, Kh), out_dtype),
        grid_spec=pltpu.PrefetchScalarGridSpec(
            num_scalar_prefetch=0,
            grid=(nb,),                                          # row blocks; last block masked
            in_specs=[
                pl.BlockSpec((tm, C1), lambda ib: (ib, 0)),      # x tile (native dtype)
                pl.BlockSpec((C1, KK), lambda ib: (0, 0)),       # weights: resident
                pl.BlockSpec((1, KK), lambda ib: (0, 0)),        # folded BN shift: resident
            ],
            out_specs=pl.BlockSpec((rows, k, W, Kh), lambda ib: (ib, 0, 0, 0)),
        ),
        compiler_params=pltpu.CompilerParams(
            dimension_semantics=("parallel",),
            vmem_limit_bytes=vmem_limit,
        ),
        cost_estimate=cost,
    )(x_flat, w2, shift)

    # Memory order of `out` is n, i, di, j, (dj, c) == NHWC of the upsampled map -> free reshape.
    y = out.reshape(N, k * H, k * W, C2p)
    if C2p != C2:
        y = y[..., :C2]                     # only taken when the cheap-pad heuristic chose padding
    return y


def conv_transpose_bn_silu_nchw(x_nchw, weight, bn_gamma, bn_beta, bn_mean, bn_var,
                                *, k=2, s=2, eps=1e-5, out_dtype=jnp.bfloat16):
    """PyTorch-layout (NCHW) compatibility wrapper around the NHWC kernel entry."""
    x_nhwc = jnp.transpose(x_nchw, (0, 2, 3, 1))
    y = conv_transpose_bn_silu_nhwc(x_nhwc, weight, bn_gamma, bn_beta, bn_mean, bn_var,
                                    k=k, s=s, eps=eps, out_dtype=out_dtype)
    return jnp.transpose(y, (0, 3, 1, 2))


# ---------------------------------------------------------------------------
# Pure-JAX (f32) reference for the same math.
# ---------------------------------------------------------------------------
def _reference(x_nchw, weight, bn_gamma, bn_beta, bn_mean, bn_var, eps=1e-5):
    N, C1, H, W = x_nchw.shape
    _, C2, k, _ = weight.shape
    # out[n, co, 2i+di, 2j+dj] = sum_ci x[n, ci, i, j] * w[ci, co, di, dj]
    t = jnp.einsum("ncij,cokl->noikjl", x_nchw, weight)
    out = t.reshape(N, C2, H * k, W * k)
    scale = (bn_gamma / jnp.sqrt(bn_var + eps))[None, :, None, None]
    shift = (bn_beta - bn_mean * bn_gamma / jnp.sqrt(bn_var + eps))[None, :, None, None]
    y = out * scale + shift
    return y * jax.nn.sigmoid(y)


if __name__ == "__main__":
    key = jax.random.PRNGKey(0)
    kx, kw = jax.random.split(key)

    N, C1, C2, H, W = 2, 4, 8, 16, 16
    k = 2

    x = jax.random.normal(kx, (N, C1, H, W), dtype=jnp.float32)
    # ConvTranspose2d weight layout: (in_channels, out_channels, kH, kW); bias=False since bn=True.
    weight = 0.1 * jax.random.normal(kw, (C1, C2, k, k), dtype=jnp.float32)

    # Deterministic BatchNorm2d parameters / running stats (eval-mode folding).
    bn_gamma = 0.5 + 0.05 * jnp.arange(C2, dtype=jnp.float32)
    bn_beta = -0.1 + 0.02 * jnp.arange(C2, dtype=jnp.float32)
    bn_mean = 0.01 * jnp.arange(C2, dtype=jnp.float32)
    bn_var = 1.0 + 0.1 * jnp.arange(C2, dtype=jnp.float32)

    fwd = jax.jit(lambda a, b, c, d, e, f: conv_transpose_bn_silu_nchw(a, b, c, d, e, f))
    out = jax.block_until_ready(fwd(x, weight, bn_gamma, bn_beta, bn_mean, bn_var))

    ref = _reference(x, weight, bn_gamma, bn_beta, bn_mean, bn_var)
    assert out.shape == (N, C2, H * 2, W * 2)
    # bf16 weights/activations/output with f32 accumulation -> loosened tolerance.
    np.testing.assert_allclose(np.asarray(out, dtype=np.float32), np.asarray(ref),
                               rtol=2e-2, atol=1e-2)

    print("KERNEL_OK")
</pallas_src>

<mosaic_0001>
module attributes {stable_mosaic.version = 11 : i64} {
  func.func @_fused_deconv_bn_silu_kernel(%arg0: i32, %arg1: memref<256x4xf32, #tpu.memory_space<vmem>>, %arg2: memref<4x32xbf16, #tpu.memory_space<vmem>>, %arg3: memref<1x32xf32, #tpu.memory_space<vmem>>, %arg4: memref<16x2x16x16xbf16, #tpu.memory_space<vmem>>) attributes {dimension_semantics = [#tpu.dimension_semantics<parallel>], iteration_bounds = array<i64: 2>, scalar_prefetch = 0 : i64, scratch_operands = 0 : i64, tpu.core_type = #tpu.core_type<tc>, window_params = [{transform_indices = @transform_0, window_bounds = array<i64: 256, 4>}, {pipeline_mode = #tpu.pipeline_mode<synchronous>, transform_indices = @transform_1, window_bounds = array<i64: 4, 32>}, {pipeline_mode = #tpu.pipeline_mode<synchronous>, transform_indices = @transform_2, window_bounds = array<i64: 1, 32>}, {transform_indices = @transform_3, window_bounds = array<i64: 16, 2, 16, 16>}]} {
    %c0 = arith.constant 0 : index
    %c0_0 = arith.constant 0 : index
    %0 = vector.load %arg1[%c0, %c0_0] : memref<256x4xf32, #tpu.memory_space<vmem>>, vector<256x4xf32>
    %1 = arith.truncf %0 : vector<256x4xf32> to vector<256x4xbf16>
    %c0_1 = arith.constant 0 : index
    %c0_2 = arith.constant 0 : index
    %2 = vector.load %arg2[%c0_1, %c0_2] : memref<4x32xbf16, #tpu.memory_space<vmem>>, vector<4x32xbf16>
    %cst = arith.constant dense<0.000000e+00> : vector<256x32xf32>
    %3 = tpu.matmul %1, %2, %cst {dimension_numbers = #tpu.dot_dimension_numbers<[1], [0], [0], [1], [0, 0, 1, 1], [], []>} : vector<256x4xbf16>, vector<4x32xbf16>, vector<256x32xf32> -> vector<256x32xf32>
    %c0_3 = arith.constant 0 : index
    %c0_4 = arith.constant 0 : index
    %4 = vector.load %arg3[%c0_3, %c0_4] : memref<1x32xf32, #tpu.memory_space<vmem>>, vector<1x32xf32>
    %5 = vector.broadcast %4 : vector<1x32xf32> to vector<256x32xf32>
    %6 = arith.addf %3, %5 : vector<256x32xf32>
    %cst_5 = arith.constant 0.000000e+00 : f32
    %7 = vector.broadcast %cst_5 : f32 to vector<256x32xf32>
    %8 = arith.subf %7, %6 : vector<256x32xf32>
    %9 = math.exp %8 : vector<256x32xf32>
    %cst_6 = arith.constant 1.000000e+00 : f32
    %10 = vector.broadcast %cst_6 : f32 to vector<256x32xf32>
    %11 = arith.addf %10, %9 : vector<256x32xf32>
    %12 = tpu.reciprocal %11 {approx = true} : vector<256x32xf32> -> vector<256x32xf32>
    %13 = arith.mulf %6, %12 : vector<256x32xf32>
    %14 = arith.truncf %13 : vector<256x32xf32> to vector<256x32xbf16>
    %15 = vector.extract_strided_slice %14 {offsets = [0, 0], sizes = [256, 16], strides = [1, 1]} : vector<256x32xbf16> to vector<256x16xbf16>
    %16 = vector.shape_cast %15 : vector<256x16xbf16> to vector<16x16x16xbf16>
    %c0_7 = arith.constant 0 : index
    %c0_8 = arith.constant 0 : index
    %c0_9 = arith.constant 0 : index
    %c0_10 = arith.constant 0 : index
    %17 = vector.load %arg4[%c0_7, %c0_8, %c0_9, %c0_10] : memref<16x2x16x16xbf16, #tpu.memory_space<vmem>>, vector<16x1x16x16xbf16>
    %18 = vector.shape_cast %17 : vector<16x1x16x16xbf16> to vector<16x16x16xbf16>
    %19 = vector.shape_cast %16 : vector<16x16x16xbf16> to vector<16x1x16x16xbf16>
    tpu.vector_store %arg4[%c0_7, %c0_8, %c0_9, %c0_10], %19 {strides = array<i32>} : memref<16x2x16x16xbf16, #tpu.memory_space<vmem>>, vector<16x1x16x16xbf16>,
    %20 = vector.extract_strided_slice %14 {offsets = [0, 16], sizes = [256, 16], strides = [1, 1]} : vector<256x32xbf16> to vector<256x16xbf16>
    %21 = vector.shape_cast %20 : vector<256x16xbf16> to vector<16x16x16xbf16>
    %c0_11 = arith.constant 0 : index
    %c1 = arith.constant 1 : index
    %c0_12 = arith.constant 0 : index
    %c0_13 = arith.constant 0 : index
    %22 = vector.load %arg4[%c0_11, %c1, %c0_12, %c0_13] : memref<16x2x16x16xbf16, #tpu.memory_space<vmem>>, vector<16x1x16x16xbf16>
    %23 = vector.shape_cast %22 : vector<16x1x16x16xbf16> to vector<16x16x16xbf16>
    %24 = vector.shape_cast %21 : vector<16x16x16xbf16> to vector<16x1x16x16xbf16>
    tpu.vector_store %arg4[%c0_11, %c1, %c0_12, %c0_13], %24 {strides = array<i32>} : memref<16x2x16x16xbf16, #tpu.memory_space<vmem>>, vector<16x1x16x16xbf16>,
    return
  }
  func.func @transform_0(%arg0: i32) -> (i32, i32) {
    %c0_i32 = arith.constant 0 : i32
    %c0_i32_0 = arith.constant 0 : i32
    return %arg0, %c0_i32 : i32, i32
  }
  func.func @transform_1(%arg0: i32) -> (i32, i32) {
    %c0_i32 = arith.constant 0 : i32
    %c0_i32_0 = arith.constant 0 : i32
    %c0_i32_1 = arith.constant 0 : i32
    return %c0_i32, %c0_i32_0 : i32, i32
  }
  func.func @transform_2(%arg0: i32) -> (i32, i32) {
    %c0_i32 = arith.constant 0 : i32
    %c0_i32_0 = arith.constant 0 : i32
    %c0_i32_1 = arith.constant 0 : i32
    return %c0_i32, %c0_i32_0 : i32, i32
  }
  func.func @transform_3(%arg0: i32) -> (i32, i32, i32, i32) {
    %c0_i32 = arith.constant 0 : i32
    %c0_i32_0 = arith.constant 0 : i32
    %c0_i32_1 = arith.constant 0 : i32
    %c0_i32_2 = arith.constant 0 : i32
    return %arg0, %c0_i32, %c0_i32_0, %c0_i32_1 : i32, i32, i32, i32
  }
}

</mosaic_0001>

<bundles_post_ra>
// kernel: tile.8
= control target key start
LH: loop header
LB: loop body
LE: loop exit
PB: predicated region body
PF: predicated region fallthrough
CT: control target
= control target key end

     0   :  { %s22_s0 = inlined_call_operand.vmem [shape: f32[8], index: 0, kind: input, shape index: {}]   ;;  %s23_s1 = inlined_call_operand.vmem [shape: f32[4,8], index: 1, kind: output, shape index: {}]  }
   0x1   :  { %v4_v0 = vld [vmem:[%s22_s0] ss:$0 sm:$0xff] }
   0x2   :  { %5 = vst [vmem:[%s23_s1] sm:$0xf] %v4_v0 }

// kernel: tile.9
= control target key start
LH: loop header
LB: loop body
LE: loop exit
PB: predicated region body
PF: predicated region fallthrough
CT: control target
= control target key end

     0   :  { %vm8_vm0 = vcmask 64512   ;;  %s40_s8 = smov 8   ;;  %s41_s9 = smov 16   ;;  %vm14_vm1 = vcmask 261312   ;;  %vm20_vm2 = vcmask 195712   ;;  %vm26_vm3 = vcmask 130112   ;;  %s58_s0 = inlined_call_operand.vmem [shape: f32[4,8], index: 0, kind: input, shape index: {}]   ;;  %s59_s1 = inlined_call_operand.vmem [shape: f32[1,32], index: 1, kind: output, shape index: {}]  }
   0x1   :  { %v5_v0 = vld [vmem:[%s58_s0] sm:$0xf]  ;;  %s39_s0 = smov 24  }
   0x2   :  { %6 = vst [vmem:[#allocation1] sm:$0xf] %v5_v0 }
   0x9   :  { %v11_v1 = vld [vmem:[#allocation1 + $0x3] sm:$0x1]   ;;  %v23_v2 = vld [vmem:[#allocation1 + $0x1] sm:$0x1]   ;;  %v7_v3 = vld [vmem:[#allocation1] sm:$0x1]  }
   0xa   :  { %12 = vrot.lane.b32.xlu0 %v11_v1, %s39_s0  ;;  %24 = vrot.lane.b32.xlu1 %v23_v2, %s40_s8  ;;  %v17_v4 = vld [vmem:[#allocation1 + $0x2] sm:$0x1]   ;;  %9 = vst.msk [vmem:[#allocation0] sm:$0x1] %vm8_vm0, %v7_v3  }
   0xe   :  { %18 = vrot.lane.b32.xlu0 %v17_v4, %s41_s9 }
  0x7c   :  { %v13_v5 = vpop.permute.xlu0 %12   ;;  %v25_v6 = vpop.permute.xlu1 %24  }
  0x7d   :  { %15 = vst.msk [vmem:[#allocation0] sm:$0x1] %vm14_vm1, %v13_v5  }
  0x80   :  { %v19_v7 = vpop.permute.xlu0 %18  }
  0x81   :  { %21 = vst.msk [vmem:[#allocation0] sm:$0x1] %vm20_vm2, %v19_v7  }
  0x82   :  { %27 = vst.msk [vmem:[#allocation0] sm:$0x1] %vm26_vm3, %v25_v6  }
  0x89   :  { %v32_v8 = vld [vmem:[#allocation0] sm:$0x1] }
  0x8a   :  { %35 = vst [vmem:[%s59_s1] sm:$0x1] %v32_v8 }

// kernel: _lambda_.1
= control target key start
LH: loop header
LB: loop body
LE: loop exit
PB: predicated region body
PF: predicated region fallthrough
CT: control target
= control target key end

     0   :  { %s1334_s12 = smov 0   ;;  %s1808_s0 = inlined_call_operand.vmem [shape: f32[512,4], index: 0, kind: input, shape index: {}]   ;;  %s1809_s1 = inlined_call_operand.vmem [shape: bf16[4,32], index: 1, kind: input, shape index: {}]   ;;  %s1810_s2 = inlined_call_operand.vmem [shape: f32[1,32], index: 2, kind: input, shape index: {}]   ;;  %s1811_s3 = inlined_call_operand.vmem [shape: bf16[32,2,16,16], index: 3, kind: output, shape index: {}]  }
   0x1 LB: > { %s987_s13 = sadd.s32 4294967295, %s1311_s12   ;;  %p991_p0 = scmp.ge.s32.totalorder %s1311_s12, 1  ;;  %s1311_s12 = sphi %s1334_s12, %s13_s12  }
   0x2   : > { %p138_p1 = scmp.lt.s32.totalorder %s1311_s12, 3 }
   0x4   : > { %p139_p2 = pnand %p991_p0, %p138_p1 }
   0x5   : > { %s992_s16 = sshll.u32 (!%p139_p2), %s987_s13, 5  ;;  %s1502_s23 = sshll.u32 (!%p139_p2), %s987_s13, 4 }
   0x6   : > { %142 = sbr.rel (%p139_p2) target bundleno = 431 (0x1af), region = 32  ;;  %p164_p3 = scmp.lt.s32.totalorder (!%p139_p2), %s992_s16, 63 }
   0x7   : > { %p170_p4 = scmp.lt.s32.totalorder (!%p139_p2), %s1502_s23, 31  ;;  %s1313_s28 = smov (!%p139_p2), 112  }
   0xb   : > { %v225_v0 = vld [vmem:[%s1809_s1] sm:$0x3]  ;;  %vm282_vm0 = vcmask 1041408   ;;  %s1813_s16 = smov (!%p164_p3, %s992_s16), 63  ;;  %vm233_vm1 = vcmask 31744   ;;  %vm767_vm2 = vcmask 125952  }
   0xc   : > { %1166 = vmatprep.subr.msk.bf16.mxu0 %vm282_vm0, %v225_v0  ;;  %1167 = vmatprep.subr.msk.bf16.mxu1 %vm282_vm0, %v225_v0  ;;  %v284_v1 = vsel %vm282_vm0, %v225_v0, 0  ;;  %s993_s17 = sshll.u32 %s1813_s16, 3  ;;  %v1403_v50 = vld [vmem:[%s1810_s2] ss:$0 sm:$0xff]  ;;  %s1815_s23 = smov (!%p170_p4, %s1502_s23), 31 }
   0xd   : > { %1131 = vmatpush3.bf16.msra.mxu0 %v284_v1  ;;  %1165 = vmatpush3.bf16.msra.mxu1 %v284_v1  ;;  %s1350_s20 = scalar_lea.vmem %s1808_s0, %s993_s17  ;;  %s1080_s24 = sshll.u32 %s1815_s23, 4 }
   0xe   : > { %v177_v2 = vld [vmem:[%s1350_s20] sm:$0xff]  ;;  %v178_v3 = vld [vmem:[%s1350_s20 + $0x8] sm:$0xff]  ;;  %v179_v7 = vld [vmem:[%s1350_s20 + $0x10] sm:$0xff]  ;;  %s1568_s27 = scalar_lea.vmem %s1811_s3, %s1080_s24 }
   0xf   : > { %v193_v4 = vld [vmem:[%s1350_s20 + $0x80] sm:$0xff]  ;;  %v209_v5 = vpack.c.bf16 %v178_v3, %v177_v2  ;;  %v194_v6 = vld [vmem:[%s1350_s20 + $0x88] sm:$0xff]  ;;  %v180_v8 = vld [vmem:[%s1350_s20 + $0x18] sm:$0xff] }
  0x10   : > { %v217_v9 = vpack.c.bf16 %v194_v6, %v193_v4  ;;  %v210_v10 = vpack.c.bf16 %v180_v8, %v179_v7  ;;  %v195_v11 = vld [vmem:[%s1350_s20 + $0x90] sm:$0xff]  ;;  %v196_v12 = vld [vmem:[%s1350_s20 + $0x98] sm:$0xff]  ;;  %v181_v13 = vld [vmem:[%s1350_s20 + $0x20] sm:$0xff] }
  0x11   : > { %1132 = vmatprep.mubr.msk.bf16.mxu0 %vm233_vm1, %v209_v5  ;;  %v218_v14 = vpack.c.bf16 %v196_v12, %v195_v11  ;;  %v182_v15 = vld [vmem:[%s1350_s20 + $0x28] sm:$0xff]  ;;  %v197_v16 = vld [vmem:[%s1350_s20 + $0xa0] sm:$0xff]  ;;  %v183_v20 = vld [vmem:[%s1350_s20 + $0x30] sm:$0xff] }
  0x12   : > { %v198_v17 = vld [vmem:[%s1350_s20 + $0xa8] sm:$0xff]  ;;  %1148 = vmatprep.mubr.msk.bf16.mxu1 %vm233_vm1, %v217_v9  ;;  %1133 = vmatmul.mubr.msk.bf16.vlgmr.msra.gmra.mxu0 %vm233_vm1, %v210_v10  ;;  %v211_v18 = vpack.c.bf16 %v182_v15, %v181_v13  ;;  %v184_v21 = vld [vmem:[%s1350_s20 + $0x38] sm:$0xff]  ;;  %v199_v22 = vld [vmem:[%s1350_s20 + $0xb0] sm:$0xff] }
  0x13   : > { %v219_v19 = vpack.c.bf16 %v198_v17, %v197_v16  ;;  %1149 = vmatmul.mubr.msk.bf16.vlgmr.msra.gmra.mxu1 %vm233_vm1, %v218_v14  ;;  %v200_v23 = vld [vmem:[%s1350_s20 + $0xb8] sm:$0xff]  ;;  %v185_v24 = vld [vmem:[%s1350_s20 + $0x40] sm:$0xff]  ;;  %v186_v25 = vld [vmem:[%s1350_s20 + $0x48] sm:$0xff]  ;;  %v212_v28 = vpack.c.bf16 %v184_v21, %v183_v20 }
  0x14   : > { %1136 = vmatprep.mubr.msk.bf16.mxu0 %vm233_vm1, %v211_v18  ;;  %v201_v26 = vld [vmem:[%s1350_s20 + $0xc0] sm:$0xff]  ;;  %v202_v27 = vld [vmem:[%s1350_s20 + $0xc8] sm:$0xff]  ;;  %v220_v29 = vpack.c.bf16 %v200_v23, %v199_v22  ;;  %v213_v30 = vpack.c.bf16 %v186_v25, %v185_v24  ;;  %v187_v32 = vld [vmem:[%s1350_s20 + $0x50] sm:$0xff] }
  0x15   : > { %1152 = vmatprep.mubr.msk.bf16.mxu1 %vm233_vm1, %v219_v19  ;;  %v221_v31 = vpack.c.bf16 %v202_v27, %v201_v26  ;;  %v188_v33 = vld [vmem:[%s1350_s20 + $0x58] sm:$0xff]  ;;  %v203_v34 = vld [vmem:[%s1350_s20 + $0xd0] sm:$0xff]  ;;  %v189_v36 = vld [vmem:[%s1350_s20 + $0x60] sm:$0xff] }
  0x16   : > { %v204_v35 = vld [vmem:[%s1350_s20 + $0xd8] sm:$0xff]  ;;  %v190_v37 = vld [vmem:[%s1350_s20 + $0x68] sm:$0xff]  ;;  %v205_v38 = vld [vmem:[%s1350_s20 + $0xe0] sm:$0xff]  ;;  %v214_v40 = vpack.c.bf16 %v188_v33, %v187_v32 }
  0x17   : > { %v206_v39 = vld [vmem:[%s1350_s20 + $0xe8] sm:$0xff]  ;;  %v222_v41 = vpack.c.bf16 %v204_v35, %v203_v34  ;;  %v215_v42 = vpack.c.bf16 %v190_v37, %v189_v36  ;;  %v191_v44 = vld [vmem:[%s1350_s20 + $0x70] sm:$0xff]  ;;  %v192_v45 = vld [vmem:[%s1350_s20 + $0x78] sm:$0xff] }
  0x18   : > { %v223_v43 = vpack.c.bf16 %v206_v39, %v205_v38  ;;  %v207_v46 = vld [vmem:[%s1350_s20 + $0xf0] sm:$0xff]  ;;  %v208_v47 = vld [vmem:[%s1350_s20 + $0xf8] sm:$0xff]  ;;  %v216_v48 = vpack.c.bf16 %v192_v45, %v191_v44 }
  0x19   : > { %v224_v49 = vpack.c.bf16 %v208_v47, %v207_v46 }
  0x1a   : > { %1137 = vmatmul.mubr.msk.bf16.gmra.mxu0 %vm233_vm1, %v212_v28 }
  0x1b   : > { %1153 = vmatmul.mubr.msk.bf16.gmra.mxu1 %vm233_vm1, %v220_v29  ;;  %1140 = vmatprep.mubr.msk.bf16.mxu0 %vm233_vm1, %v213_v30 }
  0x1c   : > { %1156 = vmatprep.mubr.msk.bf16.mxu1 %vm233_vm1, %v221_v31 }
  0x22   : > { %1141 = vmatmul.mubr.msk.bf16.gmra.mxu0 %vm233_vm1, %v214_v40 }
  0x23   : > { %1157 = vmatmul.mubr.msk.bf16.gmra.mxu1 %vm233_vm1, %v222_v41  ;;  %1144 = vmatprep.mubr.msk.bf16.mxu0 %vm233_vm1, %v215_v42 }
  0x24   : > { %1160 = vmatprep.mubr.msk.bf16.mxu1 %vm233_vm1, %v223_v43 }
  0x2a   : > { %1145 = vmatmul.mubr.msk.bf16.gmra.mxu0 %vm233_vm1, %v216_v48 }
  0x2b   : > { %1161 = vmatmul.mubr.msk.bf16.gmra.mxu1 %vm233_vm1, %v224_v49 }
  0xd2   : > { %v1134_v51 = vpop.f32.mrf.mxu0 }
  0xd3   : > { %v1406_v52 = vadd.f32 %v1134_v51, %v1403_v50  ;;  %v1150_v53 = vpop.f32.mrf.mxu1 }
  0xd4   : > { %v1409_v54 = vadd.f32 %v1150_v53, %v1403_v50  ;;  %v320_v55 = vpop.f32.mrf.mxu0 }
  0xd5   : > { %v449_v56 = vsub.f32 0.0, %v1406_v52  ;;  %v1413_v57 = vadd.f32 %v1403_v50, %v320_v55  ;;  %v384_v58 = vpop.f32.mrf.mxu1 }
  0xd6   : > { %v465_v59 = vsub.f32 0.0, %v1409_v54  ;;  %v1417_v60 = vadd.f32 %v1403_v50, %v384_v58  ;;  %v1135_v61 = vpop.f32.mrf.mxu0 }
  0xd7   : > { %v483_v62 = vmul.f32 1.442695, %v449_v56  ;;  %v447_v63 = vsub.f32 0.0, %v1413_v57  ;;  %v1421_v0 = vadd.f32 %v1135_v61, %v1403_v50  ;;  %v1151_v1 = vpop.f32.mrf.mxu1 }
  0xd8   : > { %v515_v2 = vmul.f32 1.442695, %v465_v59  ;;  %v463_v3 = vsub.f32 0.0, %v1417_v60  ;;  %v1425_v4 = vadd.f32 %v1151_v1, %v1403_v50  ;;  %v323_v5 = vpop.f32.mrf.mxu0 }
  0xd9   : > { %1177 = vpow2.f32 %v483_v62  ;;  %v479_v6 = vmul.f32 1.442695, %v447_v63  ;;  %v450_v7 = vsub.f32 0.0, %v1421_v0  ;;  %v1429_v8 = vadd.f32 %v1403_v50, %v323_v5  ;;  %v387_v9 = vpop.f32.mrf.mxu1 }
  0xda   : > { %1179 = vpow2.f32 %v515_v2  ;;  %v511_v10 = vmul.f32 1.442695, %v463_v3  ;;  %v466_v11 = vsub.f32 0.0, %v1425_v4  ;;  %v1433_v12 = vadd.f32 %v1403_v50, %v387_v9  ;;  %v1138_v13 = vpop.f32.mrf.mxu0 }
  0xdb   : > { %1181 = vpow2.f32 %v479_v6  ;;  %v485_v14 = vmul.f32 1.442695, %v450_v7  ;;  %v448_v15 = vsub.f32 0.0, %v1429_v8  ;;  %v1437_v16 = vadd.f32 %v1138_v13, %v1403_v50  ;;  %v1154_v17 = vpop.f32.mrf.mxu1 }
  0xdc   : > { %1183 = vpow2.f32 %v511_v10  ;;  %v517_v18 = vmul.f32 1.442695, %v466_v11  ;;  %v464_v19 = vsub.f32 0.0, %v1433_v12  ;;  %v1441_v20 = vadd.f32 %v1154_v17, %v1403_v50  ;;  %v336_v21 = vpop.f32.mrf.mxu0 }
  0xdd   : > { %1185 = vpow2.f32 %v485_v14  ;;  %v481_v22 = vmul.f32 1.442695, %v448_v15  ;;  %v453_v23 = vsub.f32 0.0, %v1437_v16  ;;  %v1445_v24 = vadd.f32 %v1403_v50, %v336_v21  ;;  %v400_v25 = vpop.f32.mrf.mxu1 }
  0xde   : > { %1187 = vpow2.f32 %v517_v18  ;;  %v513_v26 = vmul.f32 1.442695, %v464_v19  ;;  %v469_v27 = vsub.f32 0.0, %v1441_v20  ;;  %v1449_v28 = vadd.f32 %v1403_v50, %v400_v25  ;;  %v1139_v29 = vpop.f32.mrf.mxu0 }
  0xdf   : > { %1189 = vpow2.f32 %v481_v22  ;;  %v491_v30 = vmul.f32 1.442695, %v453_v23  ;;  %v451_v31 = vsub.f32 0.0, %v1445_v24  ;;  %v1453_v32 = vadd.f32 %v1139_v29, %v1403_v50  ;;  %v1155_v33 = vpop.f32.mrf.mxu1 }
  0xe0   : > { %1191 = vpow2.f32 %v513_v26  ;;  %v523_v34 = vmul.f32 1.442695, %v469_v27  ;;  %v467_v35 = vsub.f32 0.0, %v1449_v28  ;;  %v1457_v36 = vadd.f32 %v1155_v33, %v1403_v50  ;;  %v339_v37 = vpop.f32.mrf.mxu0 }
  0xe1   : > { %1193 = vpow2.f32 %v491_v30  ;;  %v487_v38 = vmul.f32 1.442695, %v451_v31  ;;  %v454_v39 = vsub.f32 0.0, %v1453_v32  ;;  %v1461_v40 = vadd.f32 %v1403_v50, %v339_v37  ;;  %v403_v41 = vpop.f32.mrf.mxu1 }
  0xe2   : > { %1195 = vpow2.f32 %v523_v34  ;;  %v519_v42 = vmul.f32 1.442695, %v467_v35  ;;  %v470_v43 = vsub.f32 0.0, %v1457_v36  ;;  %v1465_v44 = vadd.f32 %v1403_v50, %v403_v41  ;;  %v1142_v45 = vpop.f32.mrf.mxu0 }
  0xe3   : > { %1197 = vpow2.f32 %v487_v38  ;;  %v493_v46 = vmul.f32 1.442695, %v454_v39  ;;  %v452_v47 = vsub.f32 0.0, %v1461_v40  ;;  %v1469_v48 = vadd.f32 %v1142_v45, %v1403_v50  ;;  %v1158_v49 = vpop.f32.mrf.mxu1 }
  0xe4   : > { %1199 = vpow2.f32 %v519_v42  ;;  %v525_v51 = vmul.f32 1.442695, %v470_v43  ;;  %v468_v53 = vsub.f32 0.0, %v1465_v44  ;;  %v1473_v55 = vadd.f32 %v1158_v49, %v1403_v50  ;;  %v352_v56 = vpop.f32.mrf.mxu0 }
  0xe5   : > { %1201 = vpow2.f32 %v493_v46  ;;  %v489_v58 = vmul.f32 1.442695, %v452_v47  ;;  %v1476_v59 = vadd.f32 %v1403_v50, %v352_v56  ;;  %v416_v61 = vpop.f32.mrf.mxu1  ;;  %v457_v6 = vsub.f32 0.0, %v1469_v48 }
  0xe6   : > { %v1178_v62 = vpop.eup %1177  ;;  %1203 = vpow2.f32 %v525_v51  ;;  %v521_v63 = vmul.f32 1.442695, %v468_v53  ;;  %v1479_v1 = vadd.f32 %v1403_v50, %v416_v61  ;;  %v1143_v2 = vpop.f32.mrf.mxu0  ;;  %v473_v11 = vsub.f32 0.0, %v1473_v55 }
  0xe7   : > { %v1180_v3 = vpop.eup %1179  ;;  %v545_v5 = vadd.f32 1.0, %v1178_v62  ;;  %1205 = vpow2.f32 %v489_v58  ;;  %v1159_v7 = vpop.f32.mrf.mxu1  ;;  %v455_v17 = vsub.f32 0.0, %v1476_v59  ;;  %v1485_v27 = vmul.f32 1.442695, %v457_v6 }
  0xe8   : > { %v1182_v9 = vpop.eup %1181  ;;  %v561_v10 = vadd.f32 1.0, %v1180_v3  ;;  %1207 = vpow2.f32 %v521_v63  ;;  %v355_v13 = vpop.f32.mrf.mxu0  ;;  %v471_v22 = vsub.f32 0.0, %v1479_v1  ;;  %v1488_v29 = vadd.f32 %v1143_v2, %v1403_v50 }
  0xe9   : > { %v1184_v14 = vpop.eup %1183  ;;  %1209 = vrcp.f32 %v545_v5  ;;  %v543_v15 = vadd.f32 1.0, %v1182_v9  ;;  %v419_v18 = vpop.f32.mrf.mxu1  ;;  %v1490_v34 = vmul.f32 1.442695, %v473_v11  ;;  %v1493_v35 = vadd.f32 %v1159_v7, %v1403_v50 }
  0xea   : > { %v1186_v19 = vpop.eup %1185  ;;  %1211 = vrcp.f32 %v561_v10  ;;  %v559_v21 = vadd.f32 1.0, %v1184_v14  ;;  %v1146_v23 = vpop.f32.mrf.mxu0  ;;  %v1495_v39 = vmul.f32 1.442695, %v455_v17  ;;  %v1498_v41 = vadd.f32 %v1403_v50, %v355_v13 }
  0xeb   : > { %v1188_v25 = vpop.eup %1187  ;;  %1213 = vrcp.f32 %v543_v15  ;;  %v546_v26 = vadd.f32 1.0, %v1186_v19  ;;  %v1162_v30 = vpop.f32.mrf.mxu1  ;;  %v1504_v45 = vmul.f32 1.442695, %v471_v22  ;;  %v1507_v46 = vadd.f32 %v1403_v50, %v419_v18 }
  0xec   : > { %v1190_v31 = vpop.eup %1189  ;;  %1215 = vrcp.f32 %v559_v21  ;;  %v562_v33 = vadd.f32 1.0, %v1188_v25  ;;  %v368_v47 = vpop.f32.mrf.mxu0  ;;  %v458_v53 = vsub.f32 0.0, %v1488_v29  ;;  %v1511_v56 = vadd.f32 %v1146_v23, %v1403_v50 }
  0xed   : > { %v1192_v37 = vpop.eup %1191  ;;  %1217 = vrcp.f32 %v546_v26  ;;  %v544_v38 = vadd.f32 1.0, %v1190_v31  ;;  %v432_v58 = vpop.f32.mrf.mxu1  ;;  %v474_v63 = vsub.f32 0.0, %v1493_v35  ;;  %v1515_v2 = vadd.f32 %v1162_v30, %v1403_v50 }
  0xee   : > { %v1194_v42 = vpop.eup %1193  ;;  %1219 = vrcp.f32 %v562_v33  ;;  %v560_v43 = vadd.f32 1.0, %v1192_v37  ;;  %v456_v6 = vsub.f32 0.0, %v1498_v41  ;;  %v1520_v7 = vadd.f32 %v1403_v50, %v368_v47  ;;  %v1147_v14 = vpop.f32.mrf.mxu0 }
  0xef   : > { %v1196_v49 = vpop.eup %1195  ;;  %1221 = vrcp.f32 %v544_v38  ;;  %v549_v51 = vadd.f32 1.0, %v1194_v42  ;;  %v472_v11 = vsub.f32 0.0, %v1507_v46  ;;  %v1524_v13 = vadd.f32 %v1403_v50, %v432_v58  ;;  %v1163_v26 = vpop.f32.mrf.mxu1 }
  0xf0   : > { %v1198_v61 = vpop.eup %1197  ;;  %1223 = vrcp.f32 %v560_v43  ;;  %v565_v62 = vadd.f32 1.0, %v1196_v49  ;;  %v461_v18 = vsub.f32 0.0, %v1511_v56  ;;  %v477_v19 = vsub.f32 0.0, %v1515_v2 }
  0xf1   : > { %v1200_v3 = vpop.eup %1199  ;;  %1225 = vrcp.f32 %v549_v51  ;;  %v547_v5 = vadd.f32 1.0, %v1198_v61  ;;  %v459_v23 = vsub.f32 0.0, %v1520_v7  ;;  %v475_v25 = vsub.f32 0.0, %v1524_v13 }
  0xf2   : > { %v1202_v9 = vpop.eup %1201  ;;  %1227 = vrcp.f32 %v565_v62  ;;  %v563_v10 = vadd.f32 1.0, %v1200_v3  ;;  %v501_v33 = vmul.f32 1.442695, %v458_v53  ;;  %v1536_v37 = vadd.f32 %v1147_v14, %v1403_v50  ;;  %v371_v62 = vpop.f32.mrf.mxu0 }
  0xf3   : > { %v1204_v15 = vpop.eup %1203  ;;  %1229 = vrcp.f32 %v547_v5  ;;  %v550_v17 = vadd.f32 1.0, %v1202_v9  ;;  %v533_v43 = vmul.f32 1.442695, %v474_v63  ;;  %v497_v47 = vmul.f32 1.442695, %v456_v6 }
  0xf4   : > { %v1206_v21 = vpop.eup %1205  ;;  %1231 = vrcp.f32 %v563_v10  ;;  %v566_v22 = vadd.f32 1.0, %v1204_v15  ;;  %v529_v51 = vmul.f32 1.442695, %v472_v11  ;;  %v1538_v58 = vmul.f32 1.442695, %v461_v18  ;;  %v435_v10 = vpop.f32.mrf.mxu1 }
  0xf5   : > { %v1208_v30 = vpop.eup %1207  ;;  %1233 = vrcp.f32 %v550_v17  ;;  %v548_v31 = vadd.f32 1.0, %v1206_v21  ;;  %v1540_v61 = vmul.f32 1.442695, %v477_v19  ;;  %v1542_v53 = vmul.f32 1.442695, %v459_v23 }
  0xf6   : > { %v1210_v38 = vpop.eup %1209  ;;  %1235 = vrcp.f32 %v566_v22  ;;  %v564_v42 = vadd.f32 1.0, %v1208_v30  ;;  %v1544_v5 = vmul.f32 1.442695, %v475_v25  ;;  %v1547_v9 = vadd.f32 %v1163_v26, %v1403_v50 }
  0xf7   : > { %v1212_v49 = vpop.eup %1211  ;;  %1237 = vrcp.f32 %v548_v31  ;;  %v462_v11 = vsub.f32 0.0, %v1536_v37  ;;  %v1557_v18 = vadd.f32 %v1403_v50, %v371_v62  ;;  %v609_v19 = vmul.f32 %v1210_v38, %v1406_v52 }
  0xf8   : > { %v1214_v3 = vpop.eup %1213  ;;  %1239 = vrcp.f32 %v564_v42  ;;  %v625_v14 = vmul.f32 %v1212_v49, %v1409_v54 }
  0xf9   : > { %v1216_v63 = vpop.eup %1215  ;;  %v607_v6 = vmul.f32 %v1214_v3, %v1413_v57  ;;  %1241 = vpow2.f32 %v1485_v27  ;;  %v1563_v27 = vadd.f32 %v1403_v50, %v435_v10  ;;  %v1083_v26 = vpack.c.bf16 %v609_v19, %v609_v19 }
  0xfa   : > { %v1218_v15 = vpop.eup %1217  ;;  %v623_v17 = vmul.f32 %v1216_v63, %v1417_v60  ;;  %1243 = vpow2.f32 %v1490_v34  ;;  %v1099_v23 = vpack.c.bf16 %v625_v14, %v625_v14 }
  0xfb   : > { %v1220_v21 = vpop.eup %1219  ;;  %v1081_v22 = vpack.c.bf16 %v607_v6, %v607_v6  ;;  %v610_v57 = vmul.f32 %v1218_v15, %v1421_v0  ;;  %1245 = vpow2.f32 %v1495_v39  ;;  %v478_v0 = vsub.f32 0.0, %v1547_v9  ;;  %804 = vrot.lane.b32.xlu1 %v1083_v26, %s1313_s28  ;;  %770 = vst.msk [vmem:[%s1568_s27 + $0x10] sm:$0xf] %vm767_vm2, %v1083_v26 }
  0xfc   : > { %v1222_v54 = vpop.eup %1221  ;;  %v1570_v60 = vpack.c.bf16 %v623_v17, %v623_v17  ;;  %v626_v52 = vmul.f32 %v1220_v21, %v1425_v4  ;;  %1247 = vpow2.f32 %v1504_v45  ;;  %836 = vrot.lane.b32.xlu0 %v1099_v23, %s1313_s28  ;;  %786 = vst.msk [vmem:[%s1568_s27 + $0x90] sm:$0xf] %vm767_vm2, %v1099_v23 }
  0xfd   : > { %v1224_v34 = vpop.eup %1223  ;;  %768 = vst.msk [vmem:[%s1568_s27] sm:$0xf] %vm767_vm2, %v1081_v22  ;;  %v1084_v50 = vpack.c.bf16 %v610_v57, %v610_v57  ;;  %v608_v39 = vmul.f32 %v1222_v54, %v1429_v8  ;;  %1249 = vpow2.f32 %v501_v33  ;;  %v460_v33 = vsub.f32 0.0, %v1557_v18 }
  0xfe   : > { %v1226_v25 = vpop.eup %1225  ;;  %784 = vst.msk [vmem:[%s1568_s27 + $0x80] sm:$0xf] %vm767_vm2, %v1570_v60  ;;  %v1581_v4 = vpack.c.bf16 %v626_v52, %v626_v52  ;;  %v624_v45 = vmul.f32 %v1224_v34, %v1433_v12  ;;  %1251 = vpow2.f32 %v533_v43  ;;  %v541_v10 = vmul.f32 1.442695, %v478_v0 }
  0xff   : > { %v1228_v30 = vpop.eup %1227  ;;  %771 = vst.msk [vmem:[%s1568_s27 + $0x14] sm:$0xf] %vm767_vm2, %v1084_v50  ;;  %v1586_v31 = vpack.c.bf16 %v608_v39, %v608_v39  ;;  %v613_v8 = vmul.f32 %v1226_v25, %v1437_v16  ;;  %1253 = vpow2.f32 %v497_v47  ;;  %v476_v16 = vsub.f32 0.0, %v1563_v27  ;;  %806 = vrot.lane.b32.xlu1 %v1084_v50, %s1313_s28 }
 0x100   : > { %v1230_v12 = vpop.eup %1229  ;;  %787 = vst.msk [vmem:[%s1568_s27 + $0x94] sm:$0xf] %vm767_vm2, %v1581_v4  ;;  %v1596_v38 = vpack.c.bf16 %v624_v45, %v624_v45  ;;  %v629_v42 = vmul.f32 %v1228_v30, %v1441_v20  ;;  %1255 = vpow2.f32 %v529_v51  ;;  %v509_v20 = vmul.f32 1.442695, %v462_v11  ;;  %800 = vrot.lane.b32.xlu0 %v1081_v22, %s1313_s28 }
 0x101   : > { %v1232_v43 = vpop.eup %1231  ;;  %769 = vst.msk [vmem:[%s1568_s27 + $0x4] sm:$0xf] %vm767_vm2, %v1586_v31  ;;  %v1606_v47 = vpack.c.bf16 %v613_v8, %v613_v8  ;;  %v611_v49 = vmul.f32 %v1230_v12, %v1445_v24  ;;  %1257 = vpow2.f32 %v1538_v58  ;;  %v505_v6 = vmul.f32 1.442695, %v460_v33 }
 0x102   : > { %v1234_v51 = vpop.eup %1233  ;;  %785 = vst.msk [vmem:[%s1568_s27 + $0x84] sm:$0xf] %vm767_vm2, %v1596_v38  ;;  %v1613_v62 = vpack.c.bf16 %v629_v42, %v629_v42  ;;  %v627_v3 = vmul.f32 %v1232_v43, %v1449_v28  ;;  %1259 = vpow2.f32 %v1540_v61  ;;  %v537_v14 = vmul.f32 1.442695, %v476_v16 }
 0x103   : > { %v1236_v63 = vpop.eup %1235  ;;  %774 = vst.msk [vmem:[%s1568_s27 + $0x30] sm:$0xf] %vm767_vm2, %v1606_v47  ;;  %v1620_v24 = vpack.c.bf16 %v611_v49, %v611_v49  ;;  %v614_v58 = vmul.f32 %v1234_v51, %v1453_v32  ;;  %1261 = vpow2.f32 %v1542_v53  ;;  %838 = vrot.lane.b32.xlu1 %v1581_v4, %s1313_s28 }
 0x104   : > { %v1238_v11 = vpop.eup %1237  ;;  %790 = vst.msk [vmem:[%s1568_s27 + $0xb0] sm:$0xf] %vm767_vm2, %v1613_v62  ;;  %v1628_v28 = vpack.c.bf16 %v627_v3, %v627_v3  ;;  %v630_v61 = vmul.f32 %v1236_v63, %v1457_v36  ;;  %1263 = vpow2.f32 %v1544_v5  ;;  %832 = vrot.lane.b32.xlu0 %v1570_v60, %s1313_s28 }
 0x105   : > { %v1240_v32 = vpop.eup %1239  ;;  %772 = vst.msk [vmem:[%s1568_s27 + $0x20] sm:$0xf] %vm767_vm2, %v1620_v24  ;;  %v1088_v53 = vpack.c.bf16 %v614_v58, %v614_v58  ;;  %v612_v15 = vmul.f32 %v1238_v11, %v1461_v40  ;;  %1265 = vpow2.f32 %v509_v20 }
 0x106   : > { %v1242_v17 = vpop.eup %1241  ;;  %788 = vst.msk [vmem:[%s1568_s27 + $0xa0] sm:$0xf] %vm767_vm2, %v1628_v28  ;;  %v1104_v19 = vpack.c.bf16 %v630_v61, %v630_v61  ;;  %v628_v36 = vmul.f32 %v1240_v32, %v1465_v44  ;;  %1267 = vpow2.f32 %v541_v10 }
 0x107   : > { %v1244_v5 = vpop.eup %1243  ;;  %775 = vst.msk [vmem:[%s1568_s27 + $0x34] sm:$0xf] %vm767_vm2, %v1088_v53  ;;  %v1643_v21 = vpack.c.bf16 %v612_v15, %v612_v15  ;;  %v553_v22 = vadd.f32 1.0, %v1242_v17  ;;  %1269 = vpow2.f32 %v505_v6  ;;  %834 = vrot.lane.b32.xlu1 %v1596_v38, %s1313_s28 }
 0x108   : > { %v1246_v40 = vpop.eup %1245  ;;  %791 = vst.msk [vmem:[%s1568_s27 + $0xb4] sm:$0xf] %vm767_vm2, %v1104_v19  ;;  %v1649_v57 = vpack.c.bf16 %v628_v36, %v628_v36  ;;  %v569_v54 = vadd.f32 1.0, %v1244_v5  ;;  %1271 = vpow2.f32 %v537_v14  ;;  %802 = vrot.lane.b32.xlu0 %v1586_v31, %s1313_s28 }
 0x109   : > { %v1248_v44 = vpop.eup %1247  ;;  %773 = vst.msk [vmem:[%s1568_s27 + $0x24] sm:$0xf] %vm767_vm2, %v1643_v21  ;;  %1273 = vrcp.f32 %v553_v22  ;;  %v551_v52 = vadd.f32 1.0, %v1246_v40 }
 0x10a   : > { %v1250_v0 = vpop.eup %1249  ;;  %789 = vst.msk [vmem:[%s1568_s27 + $0xa4] sm:$0xf] %vm767_vm2, %v1649_v57  ;;  %1275 = vrcp.f32 %v569_v54  ;;  %v567_v60 = vadd.f32 1.0, %v1248_v44 }
 0x10b   : > { %v1252_v34 = vpop.eup %1251  ;;  %1277 = vrcp.f32 %v551_v52  ;;  %v554_v50 = vadd.f32 1.0, %v1250_v0  ;;  %814 = vrot.lane.b32.xlu1 %v1088_v53, %s1313_s28 }
 0x10c   : > { %v1254_v39 = vpop.eup %1253  ;;  %1279 = vrcp.f32 %v567_v60  ;;  %v570_v23 = vadd.f32 1.0, %v1252_v34  ;;  %812 = vrot.lane.b32.xlu0 %v1606_v47, %s1313_s28 }
 0x10d   : > { %v1256_v25 = vpop.eup %1255  ;;  %1281 = vrcp.f32 %v554_v50  ;;  %v552_v4 = vadd.f32 1.0, %v1254_v39 }
 0x10e   : > { %v1258_v45 = vpop.eup %1257  ;;  %1283 = vrcp.f32 %v570_v23  ;;  %v568_v26 = vadd.f32 1.0, %v1256_v25 }
 0x10f   : > { %v1260_v30 = vpop.eup %1259  ;;  %1285 = vrcp.f32 %v552_v4  ;;  %v557_v8 = vadd.f32 1.0, %v1258_v45  ;;  %846 = vrot.lane.b32.xlu1 %v1104_v19, %s1313_s28 }
 0x110   : > { %v1262_v33 = vpop.eup %1261  ;;  %1287 = vrcp.f32 %v568_v26  ;;  %v573_v31 = vadd.f32 1.0, %v1260_v30  ;;  %844 = vrot.lane.b32.xlu0 %v1613_v62, %s1313_s28 }
 0x111   : > { %v1264_v12 = vpop.eup %1263  ;;  %1289 = vrcp.f32 %v557_v8  ;;  %v555_v38 = vadd.f32 1.0, %v1262_v33 }
 0x112   : > { %v1266_v42 = vpop.eup %1265  ;;  %1291 = vrcp.f32 %v573_v31  ;;  %v571_v16 = vadd.f32 1.0, %v1264_v12 }
 0x113   : > { %v1268_v43 = vpop.eup %1267  ;;  %1293 = vrcp.f32 %v555_v38  ;;  %v558_v49 = vadd.f32 1.0, %v1266_v42  ;;  %810 = vrot.lane.b32.xlu1 %v1643_v21, %s1313_s28 }
 0x114   : > { %v1270_v20 = vpop.eup %1269  ;;  %1295 = vrcp.f32 %v571_v16  ;;  %v574_v47 = vadd.f32 1.0, %v1268_v43  ;;  %808 = vrot.lane.b32.xlu0 %v1620_v24, %s1313_s28 }
 0x115   : > { %v1272_v51 = vpop.eup %1271  ;;  %1297 = vrcp.f32 %v558_v49  ;;  %v556_v3 = vadd.f32 1.0, %v1270_v20 }
 0x116   : > { %v1274_v10 = vpop.eup %1273  ;;  %1299 = vrcp.f32 %v574_v47  ;;  %v572_v63 = vadd.f32 1.0, %v1272_v51 }
 0x117   : > { %v1276_v58 = vpop.eup %1275  ;;  %v617_v6 = vmul.f32 %v1274_v10, %v1469_v48  ;;  %1301 = vrcp.f32 %v556_v3  ;;  %842 = vrot.lane.b32.xlu1 %v1649_v57, %s1313_s28 }
 0x118   : > { %v1278_v62 = vpop.eup %1277  ;;  %v633_v11 = vmul.f32 %v1276_v58, %v1473_v55  ;;  %1303 = vrcp.f32 %v572_v63  ;;  %840 = vrot.lane.b32.xlu0 %v1628_v28, %s1313_s28 }
 0x119   : > { %v1280_v61 = vpop.eup %1279  ;;  %v1091_v14 = vpack.c.bf16 %v617_v6, %v617_v6  ;;  %v615_v32 = vmul.f32 %v1278_v62, %v1476_v59 }
 0x11a   : > { %v1282_v53 = vpop.eup %1281  ;;  %v1107_v15 = vpack.c.bf16 %v633_v11, %v633_v11  ;;  %v631_v48 = vmul.f32 %v1280_v61, %v1479_v1 }
 0x11b   : > { %v1284_v17 = vpop.eup %1283  ;;  %778 = vst.msk [vmem:[%s1568_s27 + $0x50] sm:$0xf] %vm767_vm2, %v1091_v14  ;;  %v1089_v24 = vpack.c.bf16 %v615_v32, %v615_v32  ;;  %v618_v55 = vmul.f32 %v1282_v53, %v1488_v29 }
 0x11c   : > { %v1286_v19 = vpop.eup %1285  ;;  %794 = vst.msk [vmem:[%s1568_s27 + $0xd0] sm:$0xf] %vm767_vm2, %v1107_v15  ;;  %v1105_v36 = vpack.c.bf16 %v631_v48, %v631_v48  ;;  %v634_v59 = vmul.f32 %v1284_v17, %v1493_v35  ;;  %820 = vrot.lane.b32.xlu0 %v1091_v14, %s1313_s28 }
 0x11d   : > { %v1288_v1 = vpop.eup %1287  ;;  %776 = vst.msk [vmem:[%s1568_s27 + $0x40] sm:$0xf] %vm767_vm2, %v1089_v24  ;;  %v1092_v5 = vpack.c.bf16 %v618_v55, %v618_v55  ;;  %v616_v29 = vmul.f32 %v1286_v19, %v1498_v41 }
 0x11e   : > { %v1290_v21 = vpop.eup %1289  ;;  %792 = vst.msk [vmem:[%s1568_s27 + $0xc0] sm:$0xf] %vm767_vm2, %v1105_v36  ;;  %v1108_v28 = vpack.c.bf16 %v634_v59, %v634_v59  ;;  %v632_v22 = vmul.f32 %v1288_v1, %v1507_v46 }
 0x11f   : > { %v1292_v40 = vpop.eup %1291  ;;  %779 = vst.msk [vmem:[%s1568_s27 + $0x54] sm:$0xf] %vm767_vm2, %v1092_v5  ;;  %v1090_v35 = vpack.c.bf16 %v616_v29, %v616_v29  ;;  %v621_v57 = vmul.f32 %v1290_v21, %v1511_v56  ;;  %822 = vrot.lane.b32.xlu1 %v1092_v5, %s1313_s28 }
 0x120   : > { %v1294_v54 = vpop.eup %1293  ;;  %795 = vst.msk [vmem:[%s1568_s27 + $0xd4] sm:$0xf] %vm767_vm2, %v1108_v28  ;;  %v1106_v41 = vpack.c.bf16 %v632_v22, %v632_v22  ;;  %v637_v44 = vmul.f32 %v1292_v40, %v1515_v2  ;;  %852 = vrot.lane.b32.xlu0 %v1107_v15, %s1313_s28 }
 0x121   : > { %v1296_v46 = vpop.eup %1295  ;;  %777 = vst.msk [vmem:[%s1568_s27 + $0x44] sm:$0xf] %vm767_vm2, %v1090_v35  ;;  %v1095_v52 = vpack.c.bf16 %v621_v57, %v621_v57  ;;  %v619_v0 = vmul.f32 %v1294_v54, %v1520_v7 }
 0x122   : > { %v1298_v56 = vpop.eup %1297  ;;  %793 = vst.msk [vmem:[%s1568_s27 + $0xc4] sm:$0xf] %vm767_vm2, %v1106_v41  ;;  %v1111_v60 = vpack.c.bf16 %v637_v44, %v637_v44  ;;  %v635_v34 = vmul.f32 %v1296_v46, %v1524_v13 }
 0x123   : > { %v1300_v50 = vpop.eup %1299  ;;  %782 = vst.msk [vmem:[%s1568_s27 + $0x70] sm:$0xf] %vm767_vm2, %v1095_v52  ;;  %v1093_v2 = vpack.c.bf16 %v619_v0, %v619_v0  ;;  %v622_v39 = vmul.f32 %v1298_v56, %v1536_v37  ;;  %854 = vrot.lane.b32.xlu1 %v1108_v28, %s1313_s28 }
 0x124   : > { %v1302_v23 = vpop.eup %1301  ;;  %798 = vst.msk [vmem:[%s1568_s27 + $0xf0] sm:$0xf] %vm767_vm2, %v1111_v60  ;;  %v1109_v7 = vpack.c.bf16 %v635_v34, %v635_v34  ;;  %v638_v25 = vmul.f32 %v1300_v50, %v1547_v9  ;;  %816 = vrot.lane.b32.xlu0 %v1089_v24, %s1313_s28 }
 0x125   : > { %v1304_v13 = vpop.eup %1303  ;;  %780 = vst.msk [vmem:[%s1568_s27 + $0x60] sm:$0xf] %vm767_vm2, %v1093_v2  ;;  %v1096_v4 = vpack.c.bf16 %v622_v39, %v622_v39  ;;  %v620_v45 = vmul.f32 %v1302_v23, %v1557_v18 }
 0x126   : > { %796 = vst.msk [vmem:[%s1568_s27 + $0xe0] sm:$0xf] %vm767_vm2, %v1109_v7  ;;  %v1112_v37 = vpack.c.bf16 %v638_v25, %v638_v25  ;;  %v636_v26 = vmul.f32 %v1304_v13, %v1563_v27 }
 0x127   : > { %783 = vst.msk [vmem:[%s1568_s27 + $0x74] sm:$0xf] %vm767_vm2, %v1096_v4  ;;  %v1094_v30 = vpack.c.bf16 %v620_v45, %v620_v45  ;;  %818 = vrot.lane.b32.xlu1 %v1090_v35, %s1313_s28 }
 0x128   : > { %799 = vst.msk [vmem:[%s1568_s27 + $0xf4] sm:$0xf] %vm767_vm2, %v1112_v37  ;;  %v1110_v9 = vpack.c.bf16 %v636_v26, %v636_v26  ;;  %848 = vrot.lane.b32.xlu0 %v1105_v36, %s1313_s28 }
 0x129   : > { %781 = vst.msk [vmem:[%s1568_s27 + $0x64] sm:$0xf] %vm767_vm2, %v1094_v30 }
 0x12a   : > { %797 = vst.msk [vmem:[%s1568_s27 + $0xe4] sm:$0xf] %vm767_vm2, %v1110_v9 }
 0x12b   : > { %850 = vrot.lane.b32.xlu1 %v1106_v41, %s1313_s28 }
 0x12c   : > { %828 = vrot.lane.b32.xlu0 %v1095_v52, %s1313_s28 }
 0x12f   : > { %830 = vrot.lane.b32.xlu1 %v1096_v4, %s1313_s28 }
 0x130   : > { %824 = vrot.lane.b32.xlu0 %v1093_v2, %s1313_s28 }
 0x133   : > { %826 = vrot.lane.b32.xlu1 %v1094_v30, %s1313_s28 }
 0x134   : > { %856 = vrot.lane.b32.xlu0 %v1109_v7, %s1313_s28 }
 0x137   : > { %858 = vrot.lane.b32.xlu1 %v1110_v9, %s1313_s28 }
 0x138   : > { %860 = vrot.lane.b32.xlu0 %v1111_v60, %s1313_s28 }
 0x13b   : > { %862 = vrot.lane.b32.xlu1 %v1112_v37, %s1313_s28 }
 0x16d   : > { %v805_v27 = vpop.permute.xlu1 %804 }
 0x16e   : > { %v837_v18 = vpop.permute.xlu0 %836  ;;  %1048 = vst.msk [vmem:[%s1568_s27 + $0x18] sm:$0xf] %vm767_vm2, %v805_v27 }
 0x16f   : > { %1064 = vst.msk [vmem:[%s1568_s27 + $0x98] sm:$0xf] %vm767_vm2, %v837_v18 }
 0x171   : > { %v807_v33 = vpop.permute.xlu1 %806 }
 0x172   : > { %v801_v8 = vpop.permute.xlu0 %800  ;;  %1049 = vst.msk [vmem:[%s1568_s27 + $0x1c] sm:$0xf] %vm767_vm2, %v807_v33 }
 0x173   : > { %1046 = vst.msk [vmem:[%s1568_s27 + $0x8] sm:$0xf] %vm767_vm2, %v801_v8 }
 0x175   : > { %v839_v12 = vpop.permute.xlu1 %838 }
 0x176   : > { %v833_v31 = vpop.permute.xlu0 %832  ;;  %1065 = vst.msk [vmem:[%s1568_s27 + $0x9c] sm:$0xf] %vm767_vm2, %v839_v12 }
 0x177   : > { %1062 = vst.msk [vmem:[%s1568_s27 + $0x88] sm:$0xf] %vm767_vm2, %v833_v31 }
 0x179   : > { %v835_v42 = vpop.permute.xlu1 %834 }
 0x17a   : > { %v803_v38 = vpop.permute.xlu0 %802  ;;  %1063 = vst.msk [vmem:[%s1568_s27 + $0x8c] sm:$0xf] %vm767_vm2, %v835_v42 }
 0x17b   : > { %1047 = vst.msk [vmem:[%s1568_s27 + $0xc] sm:$0xf] %vm767_vm2, %v803_v38 }
 0x17d   : > { %v815_v43 = vpop.permute.xlu1 %814 }
 0x17e   : > { %v813_v16 = vpop.permute.xlu0 %812  ;;  %1053 = vst.msk [vmem:[%s1568_s27 + $0x3c] sm:$0xf] %vm767_vm2, %v815_v43 }
 0x17f   : > { %1052 = vst.msk [vmem:[%s1568_s27 + $0x38] sm:$0xf] %vm767_vm2, %v813_v16 }
 0x181   : > { %v847_v20 = vpop.permute.xlu1 %846 }
 0x182   : > { %v845_v49 = vpop.permute.xlu0 %844  ;;  %1069 = vst.msk [vmem:[%s1568_s27 + $0xbc] sm:$0xf] %vm767_vm2, %v847_v20 }
 0x183   : > { %1068 = vst.msk [vmem:[%s1568_s27 + $0xb8] sm:$0xf] %vm767_vm2, %v845_v49 }
 0x185   : > { %v811_v51 = vpop.permute.xlu1 %810 }
 0x186   : > { %v809_v47 = vpop.permute.xlu0 %808  ;;  %1051 = vst.msk [vmem:[%s1568_s27 + $0x2c] sm:$0xf] %vm767_vm2, %v811_v51 }
 0x187   : > { %1050 = vst.msk [vmem:[%s1568_s27 + $0x28] sm:$0xf] %vm767_vm2, %v809_v47 }
 0x189   : > { %v843_v10 = vpop.permute.xlu1 %842 }
 0x18a   : > { %v841_v3 = vpop.permute.xlu0 %840  ;;  %1067 = vst.msk [vmem:[%s1568_s27 + $0xac] sm:$0xf] %vm767_vm2, %v843_v10 }
 0x18b   : > { %1066 = vst.msk [vmem:[%s1568_s27 + $0xa8] sm:$0xf] %vm767_vm2, %v841_v3 }
 0x18e   : > { %v821_v63 = vpop.permute.xlu0 %820 }
 0x18f   : > { %1056 = vst.msk [vmem:[%s1568_s27 + $0x58] sm:$0xf] %vm767_vm2, %v821_v63 }
 0x191   : > { %v823_v58 = vpop.permute.xlu1 %822 }
 0x192   : > { %1057 = vst.msk [vmem:[%s1568_s27 + $0x5c] sm:$0xf] %vm767_vm2, %v823_v58  ;;  %v853_v6 = vpop.permute.xlu0 %852 }
 0x193   : > { %1072 = vst.msk [vmem:[%s1568_s27 + $0xd8] sm:$0xf] %vm767_vm2, %v853_v6 }
 0x195   : > { %v855_v62 = vpop.permute.xlu1 %854 }
 0x196   : > { %1073 = vst.msk [vmem:[%s1568_s27 + $0xdc] sm:$0xf] %vm767_vm2, %v855_v62  ;;  %v817_v11 = vpop.permute.xlu0 %816 }
 0x197   : > { %1054 = vst.msk [vmem:[%s1568_s27 + $0x48] sm:$0xf] %vm767_vm2, %v817_v11 }
 0x199   : > { %v819_v61 = vpop.permute.xlu1 %818 }
 0x19a   : > { %1055 = vst.msk [vmem:[%s1568_s27 + $0x4c] sm:$0xf] %vm767_vm2, %v819_v61  ;;  %v849_v14 = vpop.permute.xlu0 %848 }
 0x19b   : > { %1070 = vst.msk [vmem:[%s1568_s27 + $0xc8] sm:$0xf] %vm767_vm2, %v849_v14 }
 0x19d   : > { %v851_v32 = vpop.permute.xlu1 %850 }
 0x19e   : > { %1071 = vst.msk [vmem:[%s1568_s27 + $0xcc] sm:$0xf] %vm767_vm2, %v851_v32  ;;  %v829_v53 = vpop.permute.xlu0 %828 }
 0x19f   : > { %1060 = vst.msk [vmem:[%s1568_s27 + $0x78] sm:$0xf] %vm767_vm2, %v829_v53 }
 0x1a1   : > { %v831_v15 = vpop.permute.xlu1 %830 }
 0x1a2   : > { %1061 = vst.msk [vmem:[%s1568_s27 + $0x7c] sm:$0xf] %vm767_vm2, %v831_v15  ;;  %v825_v48 = vpop.permute.xlu0 %824 }
 0x1a3   : > { %1058 = vst.msk [vmem:[%s1568_s27 + $0x68] sm:$0xf] %vm767_vm2, %v825_v48 }
 0x1a5   : > { %v827_v17 = vpop.permute.xlu1 %826 }
 0x1a6   : > { %1059 = vst.msk [vmem:[%s1568_s27 + $0x6c] sm:$0xf] %vm767_vm2, %v827_v17  ;;  %v857_v24 = vpop.permute.xlu0 %856 }
 0x1a7   : > { %1074 = vst.msk [vmem:[%s1568_s27 + $0xe8] sm:$0xf] %vm767_vm2, %v857_v24 }
 0x1a9   : > { %v859_v55 = vpop.permute.xlu1 %858 }
 0x1aa   : > { %1075 = vst.msk [vmem:[%s1568_s27 + $0xec] sm:$0xf] %vm767_vm2, %v859_v55  ;;  %v861_v19 = vpop.permute.xlu0 %860 }
 0x1ab   : > { %1076 = vst.msk [vmem:[%s1568_s27 + $0xf8] sm:$0xf] %vm767_vm2, %v861_v19 }
 0x1ad   : > { %v863_v36 = vpop.permute.xlu1 %862 }
 0x1ae   : > { %1077 = vst.msk [vmem:[%s1568_s27 + $0xfc] sm:$0xf] %vm767_vm2, %v863_v36 }
 0x1af PF: > { %s13_s12 = sadd.s32 1, %s1311_s12  }
 0x1b0   : > { %p10_p5 = scmp.ge.s32.totalorder %s13_s12, 4  }
 0x1b2   :  { %12 = sbr.rel (!%p10_p5) target bundleno = 1 (0x1), region = 63 }

</bundles_post_ra>
